<compile_context>
chip_gen: v7x
topology: tpu7x:2x2x1
jax: 0.10.0
libtpu: 0.0.40
codegen_flags: <defaults>
</compile_context>

<pallas_src>
import numpy as np
import jax
import jax.numpy as jnp
from jax import lax
from jax.experimental import pallas as pl
from jax.experimental.pallas import tpu as pltpu

# ----------------------------- static geometry -----------------------------
B = 2
H, W = 9, 17                      # input spatial dims -> 192 flat features
OH1, OW1 = H - 3, W - 3           # 6, 14  conv1 (k=4, valid)
PH1, PW1 = OH1 // 2, OW1 // 2     # 3, 7   maxpool 2x2
OH2, OW2 = PH1 - 1, PW1 - 1       # 2, 6   conv2 (k=2, valid)
PH2, PW2 = OH2 // 2, OW2 // 2     # 1, 3   maxpool 2x2
C1, C2 = 32, 64
FLAT = C2 * PH2 * PW2             # 192
HID = 64
OUT_DIM = 4
OUT_PAD = 128                     # lane-dense padded logits
OUT_ROWS = 8                      # sublane-dense padded output rows

JPB = 8                           # padded (jp, b) block: slots 0..5 real
NQ2 = 4 * JPB                     # rows per pool1-quadrant slab    (= 32)
R1 = 4 * NQ2                      # conv1 im2col rows               (= 128)
KCOLS = 4 * 16                    # lanes of im2col: (conv2 tap, conv1 kk) = 64


def _conv1_gather_indices():
    """Static gather indices for the conv1 im2col matrix.

    Rows (outer->inner): pool1 quadrant q1=(di,dj), pool2 quadrant q2=(doh,dow),
    padded (jp, b) slot (8 slots, first 6 real, last 2 duplicate slot 0).
    Columns: (conv2 tap k=(kh,kw), conv1 kernel kk=(k1h,k1w)) -> 64 lanes.
    With this layout maxpool1 / maxpool2 are contiguous 8-aligned row-slab
    maxes and conv2 is a single matmul over the (tap, channel) lane dim.
    """
    b_idx = np.empty((R1, KCOLS), np.int32)
    h_idx = np.empty((R1, KCOLS), np.int32)
    w_idx = np.empty((R1, KCOLS), np.int32)
    for q1 in range(4):
        di, dj = divmod(q1, 2)
        for q2 in range(4):
            doh, dow = divmod(q2, 2)
            for s in range(JPB):
                if s < PW2 * B:
                    jp, b = divmod(s, B)
                else:                      # padding slots: duplicate slot 0
                    jp, b = 0, s - PW2 * B
                r = q1 * NQ2 + q2 * JPB + s
                oh2, ow2 = doh, 2 * jp + dow          # conv2 output position
                for tap in range(4):
                    kh, kw = divmod(tap, 2)
                    ph, pw = oh2 + kh, ow2 + kw       # pool1 position
                    oh1, ow1 = 2 * ph + di, 2 * pw + dj   # conv1 output position
                    for kk in range(16):
                        k1h, k1w = divmod(kk, 4)
                        c = tap * 16 + kk
                        b_idx[r, c] = b
                        h_idx[r, c] = oh1 + k1h
                        w_idx[r, c] = ow1 + k1w
    return b_idx, h_idx, w_idx


_B_IDX, _H_IDX, _W_IDX = _conv1_gather_indices()


# --------------------------------- kernel ----------------------------------
def ddqn_kernel(p_ref, w1_ref, b1_ref, w2_ref, b2_ref,
                wl1_ref, bl1_ref, wl2_ref, bl2_ref, out_ref):
    # conv1: taps packed in lanes, one bf16 MXU matmul           (128, 128) f32
    c1 = jnp.dot(p_ref[...], w1_ref[...], preferred_element_type=jnp.float32)
    c1 = jnp.maximum(c1 + b1_ref[...], 0.0)

    # maxpool1: four 32-row quadrant slabs (offsets 0/32/64/96)   (32, 128)
    pool1 = jnp.maximum(jnp.maximum(c1[0:32], c1[32:64]),
                        jnp.maximum(c1[64:96], c1[96:128]))

    # conv2: single (32,128)@(128,64) matmul over (tap, ch) lanes  (32, 64)
    c2 = jnp.dot(pool1.astype(jnp.bfloat16), w2_ref[...],
                 preferred_element_type=jnp.float32)
    c2 = jnp.maximum(c2 + b2_ref[...], 0.0)

    # maxpool2: four 8-row quadrant slabs (offsets 0/8/16/24)       (8, 64)
    pool2 = jnp.maximum(jnp.maximum(c2[0:8], c2[8:16]),
                        jnp.maximum(c2[16:24], c2[24:32]))
    p2b = pool2.astype(jnp.bfloat16)      # rows 0..5: jp*B + b, rows 6..7: pad

    # linear_1 as accumulation over the PW2 pooled columns (weights were
    # pre-permuted so the sum matches torch's CHW flatten)          (B, 64)
    h = (jnp.dot(p2b[0:2], wl1_ref[0], preferred_element_type=jnp.float32)
         + jnp.dot(p2b[2:4], wl1_ref[1], preferred_element_type=jnp.float32)
         + jnp.dot(p2b[4:6], wl1_ref[2], preferred_element_type=jnp.float32))
    h = jnp.maximum(h + bl1_ref[...], 0.0)

    # expand (B,64) -> (8,64) with a constant selection matmul so the final
    # store is one unmasked full-vreg (8,128) vst; rows >= B are discarded.
    ri = lax.broadcasted_iota(jnp.int32, (OUT_ROWS, B), 0)
    ci = lax.broadcasted_iota(jnp.int32, (OUT_ROWS, B), 1)
    expand = (ri == ci).astype(jnp.float32)
    h8 = jnp.dot(expand, h, preferred_element_type=jnp.float32)     # (8, 64)

    # linear_2, lane-dense padded output                            (8, 128)
    out_ref[...] = (jnp.dot(h8.astype(jnp.bfloat16), wl2_ref[...],
                            preferred_element_type=jnp.float32) + bl2_ref[...])


# ------------------------ parameter pre-packing (once) ----------------------
def pack_params(params):
    """Re-layout PyTorch-style parameters for the kernel.

    Run ONCE per parameter update; the packed tensors go straight to
    pallas_call, keeping re-layout work out of the per-call path.
    """
    w_c1, b_c1, w_c2, b_c2, w_l1, b_l1, w_l2, b_l2 = params

    # conv1: block-diagonal over the 4 conv2 taps -> lanes = tap*32 + channel
    w1m = w_c1.reshape(C1, 16).T                                   # (16, 32)
    w1_bd = jnp.kron(jnp.eye(4, dtype=w1m.dtype), w1m)             # (64, 128)
    b1m = jnp.tile(b_c1, 4).reshape(1, 4 * C1)                     # (1, 128)

    # conv2: taps stacked along the contraction rows
    w2m = jnp.transpose(w_c2, (2, 3, 1, 0)).reshape(4 * C1, C2)    # (128, 64)
    b2m = b_c2.reshape(1, C2)

    # linear_1: per-pooled-column weights, wl1m[jp, c, h] = w_l1[h, c*PW2 + jp]
    wl1m = jnp.transpose(w_l1.reshape(HID, C2, PH2, PW2),
                         (3, 2, 1, 0)).reshape(PW2, C2, HID)       # (3, 64, 64)
    bl1m = b_l1.reshape(1, HID)

    # linear_2: lane-dense zero-padded final layer
    wl2m = jnp.zeros((HID, OUT_PAD), jnp.float32).at[:, :OUT_DIM].set(w_l2.T)
    bl2m = jnp.zeros((1, OUT_PAD), jnp.float32).at[:, :OUT_DIM].set(b_l2)

    # bf16 MXU operands; biases stay f32 (element-wise math stays f32 in-kernel)
    return (w1_bd.astype(jnp.bfloat16), b1m,
            w2m.astype(jnp.bfloat16), b2m,
            wl1m.astype(jnp.bfloat16), bl1m,
            wl2m.astype(jnp.bfloat16), bl2m)


# ------------------------------ jitted forward ------------------------------
@jax.jit
def ddqn_forward_packed(x, packed):
    """x: (B, 1, H, W) float32 (NCHW); packed: output of pack_params."""
    # slab-ordered im2col gather (layout only; all compute is in-kernel)
    x2 = x[:, 0, :, :]
    patches = x2[_B_IDX, _H_IDX, _W_IDX].astype(jnp.bfloat16)      # (128, 64)

    out = pl.pallas_call(
        ddqn_kernel,
        out_shape=jax.ShapeDtypeStruct((OUT_ROWS, OUT_PAD), jnp.float32),
        in_specs=[pl.BlockSpec(memory_space=pltpu.MemorySpace.VMEM)] * 9,
        out_specs=pl.BlockSpec(memory_space=pltpu.MemorySpace.VMEM),
    )(patches, *packed)
    return out[:B, :OUT_DIM]


def ddqn_forward(x, params):
    """Convenience wrapper (packs weights then runs the jitted forward)."""
    return ddqn_forward_packed(x, pack_params(params))


# ------------------------------- reference ----------------------------------
@jax.jit
def ddqn_reference(x, params):
    """Plain-JAX f32 reference with PyTorch (NCHW) semantics."""
    w_c1, b_c1, w_c2, b_c2, w_l1, b_l1, w_l2, b_l2 = params
    dn = ('NCHW', 'OIHW', 'NCHW')
    y = lax.conv_general_dilated(x, w_c1, (1, 1), 'VALID', dimension_numbers=dn)
    y = jnp.maximum(y + b_c1[None, :, None, None], 0.0)
    y = lax.reduce_window(y, -jnp.inf, lax.max, (1, 1, 2, 2), (1, 1, 2, 2), 'VALID')
    y = lax.conv_general_dilated(y, w_c2, (1, 1), 'VALID', dimension_numbers=dn)
    y = jnp.maximum(y + b_c2[None, :, None, None], 0.0)
    y = lax.reduce_window(y, -jnp.inf, lax.max, (1, 1, 2, 2), (1, 1, 2, 2), 'VALID')
    y = y.reshape(y.shape[0], -1)
    y = jnp.maximum(y @ w_l1.T + b_l1, 0.0)
    return y @ w_l2.T + b_l2


if __name__ == "__main__":
    key = jax.random.PRNGKey(0)
    ks = jax.random.split(key, 9)

    def init(k, shape, fan_in):
        bound = 1.0 / np.sqrt(fan_in)
        return jax.random.uniform(k, shape, jnp.float32, -bound, bound)

    params = (
        init(ks[0], (C1, 1, 4, 4), 16),       init(ks[1], (C1,), 16),
        init(ks[2], (C2, C1, 2, 2), C1 * 4),  init(ks[3], (C2,), C1 * 4),
        init(ks[4], (HID, FLAT), FLAT),       init(ks[5], (HID,), FLAT),
        init(ks[6], (OUT_DIM, HID), HID),     init(ks[7], (OUT_DIM,), HID),
    )
    x = jax.random.uniform(ks[8], (B, 1, H, W), jnp.float32)

    packed = jax.block_until_ready(pack_params(params))   # once per param update

    out = jax.block_until_ready(ddqn_forward_packed(x, packed))
    ref = jax.block_until_ready(ddqn_reference(x, params))

    assert out.shape == (B, OUT_DIM)
    # bf16 MXU operands (f32 accumulation) -> loosened tolerance vs f32 reference
    np.testing.assert_allclose(np.asarray(out), np.asarray(ref),
                               atol=2e-2, rtol=2e-2)
    print("KERNEL_OK")
</pallas_src>

<mosaic_0001>
module attributes {stable_mosaic.version = 11 : i64} {
  func.func @ddqn_kernel(%arg0: memref<128x64xbf16, #tpu.memory_space<vmem>>, %arg1: memref<64x128xbf16, #tpu.memory_space<vmem>>, %arg2: memref<1x128xf32, #tpu.memory_space<vmem>>, %arg3: memref<128x64xbf16, #tpu.memory_space<vmem>>, %arg4: memref<1x64xf32, #tpu.memory_space<vmem>>, %arg5: memref<3x64x64xbf16, #tpu.memory_space<vmem>>, %arg6: memref<1x64xf32, #tpu.memory_space<vmem>>, %arg7: memref<64x128xbf16, #tpu.memory_space<vmem>>, %arg8: memref<1x128xf32, #tpu.memory_space<vmem>>, %arg9: memref<8x128xf32, #tpu.memory_space<vmem>>) attributes {dimension_semantics = [], scalar_prefetch = 0 : i64, scratch_operands = 0 : i64, tpu.core_type = #tpu.core_type<tc>} {
    %c0 = arith.constant 0 : index
    %c0_0 = arith.constant 0 : index
    %0 = vector.load %arg0[%c0, %c0_0] : memref<128x64xbf16, #tpu.memory_space<vmem>>, vector<128x64xbf16>
    %c0_1 = arith.constant 0 : index
    %c0_2 = arith.constant 0 : index
    %1 = vector.load %arg1[%c0_1, %c0_2] : memref<64x128xbf16, #tpu.memory_space<vmem>>, vector<64x128xbf16>
    %cst = arith.constant dense<0.000000e+00> : vector<128x128xf32>
    %2 = tpu.matmul %0, %1, %cst {dimension_numbers = #tpu.dot_dimension_numbers<[1], [0], [0], [1], [0, 0, 1, 1], [], []>} : vector<128x64xbf16>, vector<64x128xbf16>, vector<128x128xf32> -> vector<128x128xf32>
    %c0_3 = arith.constant 0 : index
    %c0_4 = arith.constant 0 : index
    %3 = vector.load %arg2[%c0_3, %c0_4] : memref<1x128xf32, #tpu.memory_space<vmem>>, vector<1x128xf32>
    %4 = vector.broadcast %3 : vector<1x128xf32> to vector<128x128xf32>
    %5 = arith.addf %2, %4 : vector<128x128xf32>
    %cst_5 = arith.constant 0.000000e+00 : f32
    %6 = vector.broadcast %cst_5 : f32 to vector<128x128xf32>
    %7 = arith.maximumf %5, %6 : vector<128x128xf32>
    %8 = vector.extract_strided_slice %7 {offsets = [0, 0], sizes = [32, 128], strides = [1, 1]} : vector<128x128xf32> to vector<32x128xf32>
    %9 = vector.extract_strided_slice %7 {offsets = [32, 0], sizes = [32, 128], strides = [1, 1]} : vector<128x128xf32> to vector<32x128xf32>
    %10 = arith.maximumf %8, %9 : vector<32x128xf32>
    %11 = vector.extract_strided_slice %7 {offsets = [64, 0], sizes = [32, 128], strides = [1, 1]} : vector<128x128xf32> to vector<32x128xf32>
    %12 = vector.extract_strided_slice %7 {offsets = [96, 0], sizes = [32, 128], strides = [1, 1]} : vector<128x128xf32> to vector<32x128xf32>
    %13 = arith.maximumf %11, %12 : vector<32x128xf32>
    %14 = arith.maximumf %10, %13 : vector<32x128xf32>
    %15 = arith.truncf %14 : vector<32x128xf32> to vector<32x128xbf16>
    %c0_6 = arith.constant 0 : index
    %c0_7 = arith.constant 0 : index
    %16 = vector.load %arg3[%c0_6, %c0_7] : memref<128x64xbf16, #tpu.memory_space<vmem>>, vector<128x64xbf16>
    %cst_8 = arith.constant dense<0.000000e+00> : vector<32x64xf32>
    %17 = tpu.matmul %15, %16, %cst_8 {dimension_numbers = #tpu.dot_dimension_numbers<[1], [0], [0], [1], [0, 0, 1, 1], [], []>} : vector<32x128xbf16>, vector<128x64xbf16>, vector<32x64xf32> -> vector<32x64xf32>
    %c0_9 = arith.constant 0 : index
    %c0_10 = arith.constant 0 : index
    %18 = vector.load %arg4[%c0_9, %c0_10] : memref<1x64xf32, #tpu.memory_space<vmem>>, vector<1x64xf32>
    %19 = vector.broadcast %18 : vector<1x64xf32> to vector<32x64xf32>
    %20 = arith.addf %17, %19 : vector<32x64xf32>
    %cst_11 = arith.constant 0.000000e+00 : f32
    %21 = vector.broadcast %cst_11 : f32 to vector<32x64xf32>
    %22 = arith.maximumf %20, %21 : vector<32x64xf32>
    %23 = vector.extract_strided_slice %22 {offsets = [0, 0], sizes = [8, 64], strides = [1, 1]} : vector<32x64xf32> to vector<8x64xf32>
    %24 = vector.extract_strided_slice %22 {offsets = [8, 0], sizes = [8, 64], strides = [1, 1]} : vector<32x64xf32> to vector<8x64xf32>
    %25 = arith.maximumf %23, %24 : vector<8x64xf32>
    %26 = vector.extract_strided_slice %22 {offsets = [16, 0], sizes = [8, 64], strides = [1, 1]} : vector<32x64xf32> to vector<8x64xf32>
    %27 = vector.extract_strided_slice %22 {offsets = [24, 0], sizes = [8, 64], strides = [1, 1]} : vector<32x64xf32> to vector<8x64xf32>
    %28 = arith.maximumf %26, %27 : vector<8x64xf32>
    %29 = arith.maximumf %25, %28 : vector<8x64xf32>
    %30 = arith.truncf %29 : vector<8x64xf32> to vector<8x64xbf16>
    %31 = vector.extract_strided_slice %30 {offsets = [0, 0], sizes = [2, 64], strides = [1, 1]} : vector<8x64xbf16> to vector<2x64xbf16>
    %c0_12 = arith.constant 0 : index
    %c0_13 = arith.constant 0 : index
    %c0_14 = arith.constant 0 : index
    %32 = vector.load %arg5[%c0_12, %c0_13, %c0_14] : memref<3x64x64xbf16, #tpu.memory_space<vmem>>, vector<1x64x64xbf16>
    %33 = vector.shape_cast %32 : vector<1x64x64xbf16> to vector<64x64xbf16>
    %cst_15 = arith.constant dense<0.000000e+00> : vector<2x64xf32>
    %34 = tpu.matmul %31, %33, %cst_15 {dimension_numbers = #tpu.dot_dimension_numbers<[1], [0], [0], [1], [0, 0, 1, 1], [], []>} : vector<2x64xbf16>, vector<64x64xbf16>, vector<2x64xf32> -> vector<2x64xf32>
    %35 = vector.extract_strided_slice %30 {offsets = [2, 0], sizes = [2, 64], strides = [1, 1]} : vector<8x64xbf16> to vector<2x64xbf16>
    %c1 = arith.constant 1 : index
    %c0_16 = arith.constant 0 : index
    %c0_17 = arith.constant 0 : index
    %36 = vector.load %arg5[%c1, %c0_16, %c0_17] : memref<3x64x64xbf16, #tpu.memory_space<vmem>>, vector<1x64x64xbf16>
    %37 = vector.shape_cast %36 : vector<1x64x64xbf16> to vector<64x64xbf16>
    %cst_18 = arith.constant dense<0.000000e+00> : vector<2x64xf32>
    %38 = tpu.matmul %35, %37, %cst_18 {dimension_numbers = #tpu.dot_dimension_numbers<[1], [0], [0], [1], [0, 0, 1, 1], [], []>} : vector<2x64xbf16>, vector<64x64xbf16>, vector<2x64xf32> -> vector<2x64xf32>
    %39 = arith.addf %34, %38 : vector<2x64xf32>
    %40 = vector.extract_strided_slice %30 {offsets = [4, 0], sizes = [2, 64], strides = [1, 1]} : vector<8x64xbf16> to vector<2x64xbf16>
    %c2 = arith.constant 2 : index
    %c0_19 = arith.constant 0 : index
    %c0_20 = arith.constant 0 : index
    %41 = vector.load %arg5[%c2, %c0_19, %c0_20] : memref<3x64x64xbf16, #tpu.memory_space<vmem>>, vector<1x64x64xbf16>
    %42 = vector.shape_cast %41 : vector<1x64x64xbf16> to vector<64x64xbf16>
    %cst_21 = arith.constant dense<0.000000e+00> : vector<2x64xf32>
    %43 = tpu.matmul %40, %42, %cst_21 {dimension_numbers = #tpu.dot_dimension_numbers<[1], [0], [0], [1], [0, 0, 1, 1], [], []>} : vector<2x64xbf16>, vector<64x64xbf16>, vector<2x64xf32> -> vector<2x64xf32>
    %44 = arith.addf %39, %43 : vector<2x64xf32>
    %c0_22 = arith.constant 0 : index
    %c0_23 = arith.constant 0 : index
    %45 = vector.load %arg6[%c0_22, %c0_23] : memref<1x64xf32, #tpu.memory_space<vmem>>, vector<1x64xf32>
    %46 = vector.broadcast %45 : vector<1x64xf32> to vector<2x64xf32>
    %47 = arith.addf %44, %46 : vector<2x64xf32>
    %cst_24 = arith.constant 0.000000e+00 : f32
    %48 = vector.broadcast %cst_24 : f32 to vector<2x64xf32>
    %49 = arith.maximumf %47, %48 : vector<2x64xf32>
    %50 = tpu.iota {dimensions = array<i32: 0>} : vector<8x2xi32>
    %51 = tpu.iota {dimensions = array<i32: 1>} : vector<8x2xi32>
    %52 = arith.cmpi eq, %50, %51 : vector<8x2xi32>
    %53 = arith.extui %52 : vector<8x2xi1> to vector<8x2xi32>
    %54 = arith.sitofp %53 : vector<8x2xi32> to vector<8x2xf32>
    %cst_25 = arith.constant dense<0.000000e+00> : vector<8x64xf32>
    %55 = tpu.matmul %54, %49, %cst_25 {dimension_numbers = #tpu.dot_dimension_numbers<[1], [0], [0], [1], [0, 0, 1, 1], [], []>} : vector<8x2xf32>, vector<2x64xf32>, vector<8x64xf32> -> vector<8x64xf32>
    %56 = arith.truncf %55 : vector<8x64xf32> to vector<8x64xbf16>
    %c0_26 = arith.constant 0 : index
    %c0_27 = arith.constant 0 : index
    %57 = vector.load %arg7[%c0_26, %c0_27] : memref<64x128xbf16, #tpu.memory_space<vmem>>, vector<64x128xbf16>
    %cst_28 = arith.constant dense<0.000000e+00> : vector<8x128xf32>
    %58 = tpu.matmul %56, %57, %cst_28 {dimension_numbers = #tpu.dot_dimension_numbers<[1], [0], [0], [1], [0, 0, 1, 1], [], []>} : vector<8x64xbf16>, vector<64x128xbf16>, vector<8x128xf32> -> vector<8x128xf32>
    %c0_29 = arith.constant 0 : index
    %c0_30 = arith.constant 0 : index
    %59 = vector.load %arg8[%c0_29, %c0_30] : memref<1x128xf32, #tpu.memory_space<vmem>>, vector<1x128xf32>
    %60 = vector.broadcast %59 : vector<1x128xf32> to vector<8x128xf32>
    %61 = arith.addf %58, %60 : vector<8x128xf32>
    %c0_31 = arith.constant 0 : index
    %c0_32 = arith.constant 0 : index
    %62 = vector.load %arg9[%c0_31, %c0_32] : memref<8x128xf32, #tpu.memory_space<vmem>>, vector<8x128xf32>
    tpu.vector_store %arg9[%c0_31, %c0_32], %61 {strides = array<i32>} : memref<8x128xf32, #tpu.memory_space<vmem>>, vector<8x128xf32>,
    return
  }
}

</mosaic_0001>

<bundles_post_ra>
// kernel: ddqn_forward_packed.1
= control target key start
LH: loop header
LB: loop body
LE: loop exit
PB: predicated region body
PF: predicated region fallthrough
CT: control target
= control target key end

     0   :  { %vm128_vm0 = vcmask 523264   ;;  %v1071_v20 = vmov 0.0   ;;  %vm1072_vm1 = vmmov 0   ;;  %vm659_vm3 = vcmask 1041408   ;;  %s1286_s1 = inlined_call_operand.vmem [shape: bf16[64,128], index: 1, kind: input, shape index: {}]   ;;  %s1287_s0 = inlined_call_operand.vmem [shape: bf16[128,64], index: 0, kind: input, shape index: {}]   ;;  %s1288_s3 = inlined_call_operand.vmem [shape: bf16[128,64], index: 3, kind: input, shape index: {}]   ;;  %s1289_s5 = inlined_call_operand.vmem [shape: bf16[3,64,64], index: 5, kind: input, shape index: {}]   ;;  %s1290_s2 = inlined_call_operand.vmem [shape: f32[1,128], index: 2, kind: input, shape index: {}]   ;;  %s1291_s4 = inlined_call_operand.vmem [shape: f32[1,64], index: 4, kind: input, shape index: {}]   ;;  %s1292_s7 = inlined_call_operand.vmem [shape: bf16[64,128], index: 7, kind: input, shape index: {}]   ;;  %s1293_s6 = inlined_call_operand.vmem [shape: f32[1,64], index: 6, kind: input, shape index: {}]   ;;  %s1294_s8 = inlined_call_operand.vmem [shape: f32[1,128], index: 8, kind: input, shape index: {}]   ;;  %s1295_s9 = inlined_call_operand.vmem [shape: f32[8,128], index: 9, kind: output, shape index: {}]  }
   0x1   :  { %v1035_v0 = vld [vmem:[%s1286_s1] sm:$0xff]   ;;  %v1036_v1 = vld [vmem:[%s1286_s1 + $0x8] sm:$0xff]   ;;  %v1037_v2 = vld [vmem:[%s1286_s1 + $0x10] sm:$0xff]   ;;  %vm655_vm4 = vcmask 15360  }
   0x2   :  { %936 = vmatprep.subr.bf16.mxu0 %v1035_v0  ;;  %v1039_v3 = vld [vmem:[%s1287_s0] sm:$0xff]   ;;  %v1038_v4 = vld [vmem:[%s1286_s1 + $0x18] sm:$0xff]   ;;  %v1040_v5 = vld [vmem:[%s1287_s0 + $0x8] sm:$0xff]  }
   0x3   :  { %937 = vmatpush3.bf16.msra.mxu0 %v1035_v0  ;;  %944 = vmatprep.mubr.msk.bf16.mxu0 %vm128_vm0, %v1039_v3  ;;  %v1041_v6 = vld [vmem:[%s1287_s0 + $0x10] sm:$0xff]   ;;  %v1042_v7 = vld [vmem:[%s1287_s0 + $0x18] sm:$0xff]   ;;  %v1043_v8 = vld [vmem:[%s1287_s0 + $0x20] sm:$0xff]  }
   0x4   :  { %938 = vmatprep.subr.bf16.mxu0 %v1036_v1  ;;  %v1044_v9 = vld [vmem:[%s1287_s0 + $0x28] sm:$0xff]   ;;  %v1045_v10 = vld [vmem:[%s1287_s0 + $0x30] sm:$0xff]   ;;  %v1046_v11 = vld [vmem:[%s1287_s0 + $0x38] sm:$0xff]  }
   0x5   :  { %v1047_v12 = vld [vmem:[%s1288_s3] sm:$0xff]   ;;  %v1048_v13 = vld [vmem:[%s1288_s3 + $0x8] sm:$0xff]   ;;  %v1049_v14 = vld [vmem:[%s1288_s3 + $0x10] sm:$0xff]  }
   0x6   :  { %960 = vmatprep.subr.bf16.mxu1 %v1047_v12  ;;  %v1050_v15 = vld [vmem:[%s1288_s3 + $0x18] sm:$0xff]   ;;  %v1051_v16 = vld [vmem:[%s1288_s3 + $0x20] sm:$0xff]   ;;  %v1052_v17 = vld [vmem:[%s1288_s3 + $0x28] sm:$0xff]  }
   0x7   :  { %939 = vmatpush3.bf16.msra.mxu0 %v1036_v1  ;;  %961 = vmatpush3.bf16.msra.mxu1 %v1047_v12  ;;  %v1053_v18 = vld [vmem:[%s1288_s3 + $0x30] sm:$0xff]   ;;  %v1054_v19 = vld [vmem:[%s1288_s3 + $0x38] sm:$0xff]   ;;  %v1055_v21 = vld [vmem:[%s1289_s5 + $0x20] sm:$0xff]  }
   0x8   :  { %940 = vmatprep.subr.bf16.mxu0 %v1037_v2  ;;  %962 = vmatprep.subr.bf16.mxu1 %v1048_v13  ;;  %v1056_v22 = vld [vmem:[%s1289_s5 + $0x28] sm:$0xff]   ;;  %v821_v27 = vld [vmem:[%s1290_s2] ss:$0 sm:$0xff] }
   0xb   :  { %941 = vmatpush3.bf16.msra.mxu0 %v1037_v2  ;;  %963 = vmatpush3.bf16.msra.mxu1 %v1048_v13 }
   0xc   :  { %942 = vmatprep.subr.bf16.mxu0 %v1038_v4  ;;  %964 = vmatprep.subr.bf16.mxu1 %v1049_v14 }
   0xf   :  { %943 = vmatpush3.bf16.msra.mxu0 %v1038_v4  ;;  %965 = vmatpush3.bf16.msra.mxu1 %v1049_v14 }
  0x10   :  { %966 = vmatprep.subr.bf16.mxu1 %v1050_v15  ;;  %980 = vmatprep.subr.bf16.mxu0 %v1071_v20 }
  0x12   :  { %945 = vmatmul.mubr.msk.bf16.vlgmr.msra.gmra.mrb[0].mxu0 %vm128_vm0, %v1040_v5 }
  0x13   :  { %948 = vmatprep.mubr.msk.bf16.mxu0 %vm128_vm0, %v1041_v6  ;;  %967 = vmatpush3.bf16.msra.mxu1 %v1050_v15 }
  0x14   :  { %968 = vmatprep.subr.bf16.mxu1 %v1051_v16  ;;  %981 = vmatpush3.bf16.msra.mxu0 %v1055_v21 }
  0x15   :  { %982 = vmatprep.subr.bf16.mxu0 %v1071_v20 }
  0x17   :  { %969 = vmatpush3.bf16.msra.mxu1 %v1051_v16 }
  0x18   :  { %970 = vmatprep.subr.bf16.mxu1 %v1052_v17  ;;  %983 = vmatpush3.bf16.msra.mxu0 %v1056_v22 }
  0x19   :  { %984 = vmatprep.subr.bf16.mxu0 %v1071_v20 }
  0x1a   :  { %949 = vmatmul.mubr.msk.bf16.gmra.mrb[4].mxu0 %vm128_vm0, %v1042_v7 }
  0x1b   :  { %952 = vmatprep.mubr.msk.bf16.mxu0 %vm128_vm0, %v1043_v8  ;;  %971 = vmatpush3.bf16.msra.mxu1 %v1052_v17 }
  0x1c   :  { %972 = vmatprep.subr.bf16.mxu1 %v1053_v18 }
  0x1f   :  { %973 = vmatpush3.bf16.msra.mxu1 %v1053_v18 }
  0x20   :  { %974 = vmatprep.subr.bf16.mxu1 %v1054_v19 }
  0x22   :  { %953 = vmatmul.mubr.msk.bf16.gmra.mrb[8].mxu0 %vm128_vm0, %v1044_v9 }
  0x23   :  { %956 = vmatprep.mubr.msk.bf16.mxu0 %vm128_vm0, %v1045_v10  ;;  %975 = vmatpush3.bf16.msra.mxu1 %v1054_v19 }
  0x24   :  { %992 = vmatprep.subr.bf16.mxu1 %v1071_v20 }
  0x2a   :  { %957 = vmatmul.mubr.msk.bf16.gmra.mrb[12].mxu0 %vm128_vm0, %v1046_v11 }
  0x2b   :  { %988 = vmatprep.mubr.msk.bf16.mxu0 %vm1072_vm1, %v1071_v20 }
  0xe5   :  { %v946_v23 = vpop.f32.mrb[0].mxu0 }
  0xe6   :  { %v187_v24 = vpop.f32.mrb[1].mxu0  ;;  %v196_v28 = vadd.f32 %v946_v23, %v821_v27  ;;  %v1057_v23 = vld [vmem:[%s1289_s5] sm:$0xff]  }
  0xe7   :  { %v947_v25 = vpop.f32.mrb[2].mxu0  ;;  %v188_v29 = vadd.f32 %v821_v27, %v187_v24  ;;  %v1058_v24 = vld [vmem:[%s1289_s5 + $0x8] sm:$0xff]  }
  0xe8   :  { %v190_v26 = vpop.f32.mrb[3].mxu0  ;;  %v199_v31 = vadd.f32 %v947_v25, %v821_v27  ;;  %v252_v37 = vmax.f32 %v196_v28, 0.0  ;;  %v1060_v25 = vld [vmem:[%s1289_s5 + $0x10] sm:$0xff]   ;;  %v1062_v28 = vld [vmem:[%s1289_s5 + $0x38] sm:$0xff]  }
  0xe9   :  { %v191_v34 = vadd.f32 %v821_v27, %v190_v26  ;;  %v250_v41 = vmax.f32 %v188_v29, 0.0  ;;  %v1059_v26 = vld [vmem:[%s1289_s5 + $0x30] sm:$0xff]   ;;  %v842_v29 = vld [vmem:[%s1291_s4] ss:$0 sm:$0xff] }
  0xea   :  { %v253_v44 = vmax.f32 %v199_v31, 0.0  ;;  %985 = vmatpush3.bf16.msra.mxu0 %v1059_v26 }
  0xeb   :  { %v251_v47 = vmax.f32 %v191_v34, 0.0  ;;  %986 = vmatprep.subr.bf16.mxu0 %v1071_v20 }
  0xed   :  { %v950_v30 = vpop.f32.mrb[4].mxu0 }
  0xee   :  { %v212_v32 = vadd.f32 %v950_v30, %v821_v27  ;;  %v203_v33 = vpop.f32.mrb[5].mxu0  ;;  %987 = vmatpush3.bf16.msra.mxu0 %v1062_v28 }
  0xef   :  { %v204_v35 = vadd.f32 %v821_v27, %v203_v33  ;;  %v951_v36 = vpop.f32.mrb[6].mxu0  ;;  %1004 = vmatprep.subr.bf16.mxu0 %v1071_v20 }
  0xf0   :  { %v256_v38 = vmax.f32 %v212_v32, 0.0  ;;  %v215_v39 = vadd.f32 %v951_v36, %v821_v27  ;;  %v206_v40 = vpop.f32.mrb[7].mxu0 }
  0xf1   :  { %v254_v42 = vmax.f32 %v204_v35, 0.0  ;;  %v207_v43 = vadd.f32 %v821_v27, %v206_v40 }
  0xf2   :  { %v268_v45 = vmax.f32 %v252_v37, %v256_v38  ;;  %v257_v46 = vmax.f32 %v215_v39, 0.0 }
  0xf3   :  { %v266_v48 = vmax.f32 %v250_v41, %v254_v42  ;;  %v255_v49 = vmax.f32 %v207_v43, 0.0 }
  0xf4   :  { %v269_v50 = vmax.f32 %v253_v44, %v257_v46  ;;  %v1063_v46 = vld [vmem:[%s1289_s5 + $0x40] sm:$0xff]  }
  0xf5   :  { %v267_v51 = vmax.f32 %v251_v47, %v255_v49  ;;  %v954_v52 = vpop.f32.mrb[8].mxu0  ;;  %v1065_v49 = vld [vmem:[%s1289_s5 + $0x50] sm:$0xff]  }
  0xf6   :  { %v219_v53 = vpop.f32.mrb[9].mxu0  ;;  %v228_v56 = vadd.f32 %v954_v52, %v821_v27  ;;  %v1067_v52 = vld [vmem:[%s1292_s7] sm:$0xff]  }
  0xf7   :  { %v955_v54 = vpop.f32.mrb[10].mxu0  ;;  %v220_v57 = vadd.f32 %v821_v27, %v219_v53  ;;  %v1068_v53 = vld [vmem:[%s1292_s7 + $0x8] sm:$0xff]  }
  0xf8   :  { %v222_v55 = vpop.f32.mrb[11].mxu0  ;;  %v231_v59 = vadd.f32 %v955_v54, %v821_v27  ;;  %v260_v1 = vmax.f32 %v228_v56, 0.0  ;;  %v1069_v54 = vld [vmem:[%s1292_s7 + $0x10] sm:$0xff]  }
  0xf9   :  { %v223_v62 = vadd.f32 %v821_v27, %v222_v55  ;;  %v258_v5 = vmax.f32 %v220_v57, 0.0 }
  0xfa   :  { %v261_v8 = vmax.f32 %v231_v59, 0.0 }
  0xfb   :  { %v259_v11 = vmax.f32 %v223_v62, 0.0 }
  0xfd   :  { %v958_v58 = vpop.f32.mrb[12].mxu0 }
  0xfe   :  { %v244_v60 = vadd.f32 %v958_v58, %v821_v27  ;;  %v235_v61 = vpop.f32.mrb[13].mxu0 }
  0xff   :  { %v236_v63 = vadd.f32 %v821_v27, %v235_v61  ;;  %v959_v0 = vpop.f32.mrb[14].mxu0 }
 0x100   :  { %v264_v2 = vmax.f32 %v244_v60, 0.0  ;;  %v247_v3 = vadd.f32 %v959_v0, %v821_v27  ;;  %v238_v4 = vpop.f32.mrb[15].mxu0  ;;  %v648_v0 = vlaneseq }
 0x101   :  { %v262_v6 = vmax.f32 %v236_v63, 0.0  ;;  %v239_v7 = vadd.f32 %v821_v27, %v238_v4  ;;  %v1061_v27 = vld [vmem:[%s1289_s5 + $0x18] sm:$0xff]   ;;  %v882_v4 = vld [vmem:[%s1293_s6] ss:$0 sm:$0xff] }
 0x102   :  { %v272_v9 = vmax.f32 %v260_v1, %v264_v2  ;;  %v265_v10 = vmax.f32 %v247_v3, 0.0  ;;  %v649_v1 = vshrl.u32 %v648_v0, 7  ;;  %v651_v2 = vand.u32 127, %v648_v0 }
 0x103   :  { %v270_v12 = vmax.f32 %v258_v5, %v262_v6  ;;  %v263_v13 = vmax.f32 %v239_v7, 0.0 }
 0x104   :  { %v276_v14 = vmax.f32 %v268_v45, %v272_v9  ;;  %v273_v15 = vmax.f32 %v261_v8, %v265_v10  ;;  %vm652_vm2 = vcmp.eq.s32.totalorder %v649_v1, %v651_v2 }
 0x105   :  { %v271_v16 = vmax.f32 %v259_v11, %v263_v13  ;;  %v274_v17 = vmax.f32 %v266_v48, %v270_v12  ;;  %v1064_v48 = vld [vmem:[%s1289_s5 + $0x48] sm:$0xff]   ;;  %v883_v11 = vsel %vm652_vm2, 1.0, %v1071_v20  ;;  %v1070_v12 = vld [vmem:[%s1292_s7 + $0x18] sm:$0xff]  }
 0x106   :  { %v277_v18 = vmax.f32 %v269_v50, %v273_v15  ;;  %v1066_v50 = vld [vmem:[%s1289_s5 + $0x58] sm:$0xff]  }
 0x107   :  { %v275_v19 = vmax.f32 %v267_v51, %v271_v16  ;;  %v886_v16 = vld [vmem:[%s1294_s8] ss:$0 sm:$0xff] }
 0x108   :  { %v279_v21 = vpack.c.bf16 %v277_v18, %v276_v14 }
 0x109   :  { %v278_v22 = vpack.c.bf16 %v275_v19, %v274_v17 }
 0x10b   :  { %976 = vmatprep.mubr.bf16.mxu1 %v278_v22 }
 0x10c   :  { %977 = vmatmul.mubr.bf16.vlgmr.msra.gmra.mrb[0].mxu1 %v279_v21 }
 0x10d   :  { %993 = vmatpush3.bf16.msra.mxu1 %v1057_v23  ;;  %1000 = vmatprep.mubr.msk.bf16.mxu1 %vm1072_vm1, %v1071_v20 }
 0x10e   :  { %994 = vmatprep.subr.bf16.mxu1 %v1071_v20 }
 0x111   :  { %995 = vmatpush3.bf16.msra.mxu1 %v1058_v24 }
 0x112   :  { %996 = vmatprep.subr.bf16.mxu1 %v1071_v20 }
 0x115   :  { %997 = vmatpush3.bf16.msra.mxu1 %v1060_v25 }
 0x116   :  { %998 = vmatprep.subr.bf16.mxu1 %v1071_v20 }
 0x119   :  { %999 = vmatpush3.bf16.msra.mxu1 %v1061_v27 }
 0x11a   :  { %1021 = vmatprep.subr.bf16.mxu1 %v1071_v20 }
 0x1df   :  { %v978_v30 = vpop.f32.mrb[0].mxu1 }
 0x1e0   :  { %v394_v31 = vadd.f32 %v978_v30, %v842_v29  ;;  %v385_v32 = vpop.f32.mrb[1].mxu1 }
 0x1e1   :  { %v386_v33 = vadd.f32 %v842_v29, %v385_v32  ;;  %v979_v34 = vpop.f32.mrb[2].mxu1 }
 0x1e2   :  { %v397_v35 = vadd.f32 %v979_v34, %v842_v29  ;;  %v388_v36 = vpop.f32.mrb[3].mxu1  ;;  %v402_v38 = vmax.f32 %v394_v31, 0.0 }
 0x1e3   :  { %v389_v37 = vadd.f32 %v842_v29, %v388_v36  ;;  %v400_v40 = vmax.f32 %v386_v33, 0.0 }
 0x1e4   :  { %v403_v39 = vmax.f32 %v397_v35, 0.0 }
 0x1e5   :  { %v401_v41 = vmax.f32 %v389_v37, 0.0 }
 0x1e6   :  { %v405_v42 = vmax.f32 %v402_v38, %v403_v39 }
 0x1e7   :  { %v404_v43 = vmax.f32 %v400_v40, %v401_v41 }
 0x1e9   :  { %v406_v44 = vmax.f32 %v404_v43, %v405_v42 }
 0x1eb   :  { %v407_v45 = vpack.c.bf16 %v406_v44, %v406_v44 }
 0x1ed   :  { %v426_v47 = vrot.slane %v407_v45, 1  ;;  %1001 = vmatmul.mubr.msk.bf16.vlgmr.msra.gmra.mrb[4].mxu1 %vm128_vm0, %v407_v45  ;;  %v570_v51 = vrot.slane %v407_v45, 2 }
 0x1ee   :  { %1029 = vmatprep.mubr.msk.bf16.mxu1 %vm1072_vm1, %v1071_v20  ;;  %1022 = vmatpush3.bf16.msra.mxu1 %v1067_v52 }
 0x1ef   :  { %989 = vmatmul.mubr.msk.bf16.vlgmr.msra.gmra.mrb[16].mxu0 %vm128_vm0, %v426_v47  ;;  %1023 = vmatprep.subr.bf16.mxu1 %v1071_v20 }
 0x1f0   :  { %1005 = vmatpush3.bf16.msra.mxu0 %v1063_v46  ;;  %1012 = vmatprep.mubr.msk.bf16.mxu0 %vm1072_vm1, %v1071_v20 }
 0x1f1   :  { %1006 = vmatprep.subr.bf16.mxu0 %v1071_v20 }
 0x1f2   :  { %1024 = vmatpush3.bf16.msra.mxu1 %v1068_v53 }
 0x1f3   :  { %1025 = vmatprep.subr.bf16.mxu1 %v1071_v20 }
 0x1f4   :  { %1007 = vmatpush3.bf16.msra.mxu0 %v1064_v48 }
 0x1f5   :  { %1008 = vmatprep.subr.bf16.mxu0 %v1071_v20 }
 0x1f6   :  { %1026 = vmatpush3.bf16.msra.mxu1 %v1069_v54 }
 0x1f7   :  { %1027 = vmatprep.subr.bf16.mxu1 %v1071_v20 }
 0x1f8   :  { %1009 = vmatpush3.bf16.msra.mxu0 %v1065_v49 }
 0x1f9   :  { %1010 = vmatprep.subr.bf16.mxu0 %v1071_v20 }
 0x1fa   :  { %1028 = vmatpush3.bf16.msra.mxu1 %v1070_v12 }
 0x1fc   :  { %1011 = vmatpush3.bf16.msra.mxu0 %v1066_v50 }
 0x1fd   :  { %1016 = vmatprep.subr.mxu0 %v1071_v20 }
 0x1ff   :  { %1013 = vmatmul.mubr.msk.bf16.vlgmr.msra.gmra.mrb[20].mxu0 %vm128_vm0, %v570_v51 }
 0x200   :  { %1018 = vmatprep.mubr.msk.f32.mxu0 %vm1072_vm1, %v1071_v20 }
 0x2c0   :  { %v555_v55 = vpop.f32.mrb[4].mxu1 }
 0x2c1   :  { %v1002_v56 = vpop.f32.mrb[5].mxu1 }
 0x2c2   :  { %v488_v57 = vpop.f32.mrb[16].mxu0  ;;  %v558_v58 = vpop.f32.mrb[6].mxu1 }
 0x2c3   :  { %v556_v59 = vadd.f32 %v555_v55, %v488_v57  ;;  %v990_v60 = vpop.f32.mrb[17].mxu0  ;;  %v1003_v61 = vpop.f32.mrb[7].mxu1 }
 0x2c4   :  { %v491_v62 = vpop.f32.mrb[18].mxu0 }
 0x2c5   :  { %v991_v63 = vpop.f32.mrb[19].mxu0 }
 0x2d2   :  { %v632_v3 = vpop.f32.mrb[20].mxu0 }
 0x2d3   :  { %v638_v5 = vadd.f32 %v632_v3, %v556_v59  ;;  %v1014_v6 = vpop.f32.mrb[21].mxu0 }
 0x2d4   :  { %v635_v7 = vpop.f32.mrb[22].mxu0 }
 0x2d5   :  { %v646_v8 = vadd.f32 %v882_v4, %v638_v5  ;;  %v1015_v9 = vpop.f32.mrb[23].mxu0 }
 0x2d7   :  { %v647_v10 = vmax.f32 %v646_v8, 0.0 }
 0x2d9   :  { %1017 = vmatpush3.msk.msra.mxu0 %vm659_vm3, %v647_v10 }
 0x2da   :  { %1019 = vmatmul.mubr.msk.f32.vlgmr.msra.gmra.mrb[24].mxu0 %vm655_vm4, %v883_v11 }
 0x3ad   :  { %v729_v13 = vpop.f32.mrb[24].mxu0 }
 0x3ae   :  { %v733_v14 = vpack.c.bf16 %v729_v13, %v729_v13  ;;  %v1020_v15 = vpop.f32.mrb[25].mxu0 }
 0x3b0   :  { %1030 = vmatmul.mubr.msk.bf16.vlgmr.msra.gmra.mrb[8].mxu1 %vm128_vm0, %v733_v14 }
 0x483   :  { %v810_v17 = vpop.f32.mrb[8].mxu1 }
 0x484   :  { %v811_v18 = vadd.f32 %v886_v16, %v810_v17  ;;  %v1031_v20 = vpop.f32.mrb[9].mxu1 }
 0x485   :  { %v813_v19 = vpop.f32.mrb[10].mxu1 }
 0x486   :  { %816 = vst [vmem:[%s1295_s9] sm:$0xff] %v811_v18  ;;  %v1032_v21 = vpop.f32.mrb[11].mxu1 }

</bundles_post_ra>
